<compile_context>
chip_gen: v7x
topology: tpu7x:2x2x1
jax: 0.10.0
libtpu: 0.0.40
codegen_flags: <defaults>
</compile_context>

<pallas_src>
import functools

import jax
import jax.numpy as jnp
from jax import lax
from jax.experimental import pallas as pl
from jax.experimental.pallas import tpu as pltpu


def _triplet_rowblock_kernel(xblk_ref, xfull_ref, sqrow_ref, tcol_ref, trow_ref,
                             o_ref, *, margin):
    # xblk_ref : (TM, Dp)  anchor-row block of features (native dtype)
    # xfull_ref: (N,  Dp)  full candidate feature set   (native dtype)
    # sqrow_ref: (1,  N )  f32 row norms ||x_j||^2
    # tcol_ref : (TM, 1 )  int32 anchor labels
    # trow_ref : (1,  N )  int32 candidate labels
    # o_ref    : (TM, 1 )  f32 per-anchor hinge loss
    xb = xblk_ref[...]
    xf = xfull_ref[...]
    sq_row = sqrow_ref[...]
    t_col = tcol_ref[...]
    t_row = trow_ref[...]

    # Gram block on the MXU, contracting the last (lane) dim of both operands:
    # no materialized transpose of the RHS.
    gram = lax.dot_general(
        xb, xf,
        dimension_numbers=(((1,), (1,)), ((), ())),
        preferred_element_type=jnp.float32,
    )  # (TM, N) f32

    # Anchor-block norms in f32 (cheap lane reduction, naturally (TM, 1)).
    xb32 = xb.astype(jnp.float32)
    sq_i = jnp.sum(xb32 * xb32, axis=1, keepdims=True)  # (TM, 1)

    # dist2[i, j] = sq_i + (sq_j - 2 * gram[i, j]).
    # Mine on squared distances; add sq_i after the lane reduction.
    base = sq_row - 2.0 * gram  # (TM, N)

    mask = t_col == t_row  # (TM, N) bool, same-label mask (diag included)

    big = jnp.float32(1e30)
    ap2 = sq_i + jnp.max(jnp.where(mask, base, -big), axis=1, keepdims=True)
    an2 = sq_i + jnp.min(jnp.where(mask, big, base), axis=1, keepdims=True)

    # clamp(min=1e-12).sqrt() applied only to the two reduced vectors
    # (monotonicity keeps argmax/argmin and the edge cases identical).
    eps = jnp.float32(1e-12)
    dist_ap = jnp.sqrt(jnp.maximum(ap2, eps))  # (TM, 1)
    dist_an = jnp.sqrt(jnp.maximum(an2, eps))  # (TM, 1)

    # MarginRankingLoss(margin)(dist_an, dist_ap, y=1) per anchor (hinge);
    # the mean reduction is done in the wrapper.
    o_ref[...] = jnp.maximum(dist_ap - dist_an + jnp.float32(margin), 0.0)


def triplet_loss(inputs, targets, margin=0.3, block_rows=256):
    """inputs: (N, D) float features (f32 or bf16); targets: (N,) int labels."""
    n, d = inputs.shape

    # Zero-pad the feature (lane) dim to a multiple of 128.
    d_pad = ((d + 127) // 128) * 128
    x = inputs  # keep native dtype; MXU accumulates in f32
    if d_pad != d:
        x = jnp.pad(x, ((0, 0), (0, d_pad - d)))

    # Candidate row-norms in f32, supplied as a lane-major (1, N) row so the
    # kernel never transposes across lanes.
    sq_row = jnp.sum(inputs.astype(jnp.float32) ** 2, axis=1).reshape(1, n)

    t = targets.astype(jnp.int32)
    t_row = t.reshape(1, n)

    # Anchor-row tiling. The candidate dim stays the full (unpadded) N, so any
    # padded anchor rows only produce garbage hinge values that the wrapper
    # drops before the mean.
    tm = min(block_rows, n)
    tm = ((tm + 7) // 8) * 8            # sublane-aligned row block
    n_pad = ((n + tm - 1) // tm) * tm   # pad anchors only
    if n_pad != n:
        x_lhs = jnp.pad(x, ((0, n_pad - n), (0, 0)))
        t_col = jnp.pad(t, ((0, n_pad - n),)).reshape(n_pad, 1)
    else:
        x_lhs = x
        t_col = t.reshape(n, 1)

    hinge = pl.pallas_call(
        functools.partial(_triplet_rowblock_kernel, margin=float(margin)),
        out_shape=jax.ShapeDtypeStruct((n_pad, 1), jnp.float32),
        grid=(n_pad // tm,),
        in_specs=[
            pl.BlockSpec((tm, d_pad), lambda i: (i, 0)),  # anchor row block
            pl.BlockSpec((n, d_pad), lambda i: (0, 0)),   # full candidate set
            pl.BlockSpec((1, n), lambda i: (0, 0)),       # ||x_j||^2 row
            pl.BlockSpec((tm, 1), lambda i: (i, 0)),      # anchor labels
            pl.BlockSpec((1, n), lambda i: (0, 0)),       # candidate labels
        ],
        out_specs=pl.BlockSpec((tm, 1), lambda i: (i, 0)),
        compiler_params=pltpu.CompilerParams(
            dimension_semantics=("parallel",)),
    )(x_lhs, x, sq_row, t_col, t_row)

    # Mean over the real anchors only.
    return jnp.mean(hinge[:n, 0])


def _triplet_loss_ref(inputs, targets, margin=0.3):
    # Pure-JAX reference mirroring the PyTorch module.
    x = inputs.astype(jnp.float32)
    sq = jnp.sum(x * x, axis=1, keepdims=True)
    dist = jnp.sqrt(jnp.maximum(sq + sq.T - 2.0 * (x @ x.T), 1e-12))
    mask = targets[:, None] == targets[None, :]
    dist_ap = jnp.max(jnp.where(mask, dist, -jnp.inf), axis=1)
    dist_an = jnp.min(jnp.where(mask, jnp.inf, dist), axis=1)
    return jnp.mean(jnp.maximum(dist_ap - dist_an + margin, 0.0))


if __name__ == "__main__":
    key = jax.random.PRNGKey(0)

    # Test 1: small batch (4 identities x 2 images), single row block.
    n, d = 8, 32
    k1, k2 = jax.random.split(key)
    inputs = jax.random.normal(k1, (n, d), dtype=jnp.float32)
    targets = jnp.array([0, 0, 1, 1, 2, 2, 3, 3], dtype=jnp.int32)

    loss = triplet_loss(inputs, targets, margin=0.3)
    jax.block_until_ready(loss)
    ref = _triplet_loss_ref(inputs, targets, margin=0.3)
    assert jnp.allclose(loss, ref, atol=1e-5, rtol=1e-5), (loss, ref)

    # Test 2: multi-block grid with anchor padding (N=20 not a multiple of TM=8).
    n2, d2 = 20, 48
    inputs2 = jax.random.normal(k2, (n2, d2), dtype=jnp.float32)
    targets2 = (jnp.arange(n2) % 5).astype(jnp.int32)

    loss2 = triplet_loss(inputs2, targets2, margin=0.3, block_rows=8)
    jax.block_until_ready(loss2)
    ref2 = _triplet_loss_ref(inputs2, targets2, margin=0.3)
    assert jnp.allclose(loss2, ref2, atol=1e-5, rtol=1e-5), (loss2, ref2)

    print("KERNEL_OK")
</pallas_src>

<mosaic_0001>
module attributes {stable_mosaic.version = 11 : i64} {
  func.func @_triplet_rowblock_kernel(%arg0: i32, %arg1: memref<8x128xf32, #tpu.memory_space<vmem>>, %arg2: memref<8x128xf32, #tpu.memory_space<vmem>>, %arg3: memref<1x8xf32, #tpu.memory_space<vmem>>, %arg4: memref<8x1xi32, #tpu.memory_space<vmem>>, %arg5: memref<1x8xi32, #tpu.memory_space<vmem>>, %arg6: memref<8x1xf32, #tpu.memory_space<vmem>>) attributes {dimension_semantics = [#tpu.dimension_semantics<parallel>], iteration_bounds = array<i64: 1>, scalar_prefetch = 0 : i64, scratch_operands = 0 : i64, tpu.core_type = #tpu.core_type<tc>, window_params = [{transform_indices = @transform_0, window_bounds = array<i64: 8, 128>}, {pipeline_mode = #tpu.pipeline_mode<synchronous>, transform_indices = @transform_1, window_bounds = array<i64: 8, 128>}, {pipeline_mode = #tpu.pipeline_mode<synchronous>, transform_indices = @transform_2, window_bounds = array<i64: 1, 8>}, {transform_indices = @transform_3, window_bounds = array<i64: 8, 1>}, {pipeline_mode = #tpu.pipeline_mode<synchronous>, transform_indices = @transform_4, window_bounds = array<i64: 1, 8>}, {transform_indices = @transform_5, window_bounds = array<i64: 8, 1>}]} {
    %c0 = arith.constant 0 : index
    %c0_0 = arith.constant 0 : index
    %0 = vector.load %arg1[%c0, %c0_0] : memref<8x128xf32, #tpu.memory_space<vmem>>, vector<8x128xf32>
    %c0_1 = arith.constant 0 : index
    %c0_2 = arith.constant 0 : index
    %1 = vector.load %arg2[%c0_1, %c0_2] : memref<8x128xf32, #tpu.memory_space<vmem>>, vector<8x128xf32>
    %c0_3 = arith.constant 0 : index
    %c0_4 = arith.constant 0 : index
    %2 = vector.load %arg3[%c0_3, %c0_4] : memref<1x8xf32, #tpu.memory_space<vmem>>, vector<1x8xf32>
    %c0_5 = arith.constant 0 : index
    %c0_6 = arith.constant 0 : index
    %3 = vector.load %arg4[%c0_5, %c0_6] : memref<8x1xi32, #tpu.memory_space<vmem>>, vector<8x1xi32>
    %c0_7 = arith.constant 0 : index
    %c0_8 = arith.constant 0 : index
    %4 = vector.load %arg5[%c0_7, %c0_8] : memref<1x8xi32, #tpu.memory_space<vmem>>, vector<1x8xi32>
    %cst = arith.constant dense<0.000000e+00> : vector<8x8xf32>
    %5 = tpu.matmul %0, %1, %cst {dimension_numbers = #tpu.dot_dimension_numbers<[1], [1], [0], [0], [0, 0, 1, 0], [], []>} : vector<8x128xf32>, vector<8x128xf32>, vector<8x8xf32> -> vector<8x8xf32>
    %6 = arith.mulf %0, %0 : vector<8x128xf32>
    %cst_9 = arith.constant dense<0.000000e+00> : vector<8xf32>
    %7 = vector.multi_reduction <add>, %6, %cst_9 [1] : vector<8x128xf32> to vector<8xf32>
    %8 = vector.shape_cast %7 : vector<8xf32> to vector<8x1xf32>
    %cst_10 = arith.constant 2.000000e+00 : f32
    %9 = vector.broadcast %cst_10 : f32 to vector<8x8xf32>
    %10 = arith.mulf %9, %5 : vector<8x8xf32>
    %11 = vector.broadcast %2 : vector<1x8xf32> to vector<8x8xf32>
    %12 = arith.subf %11, %10 : vector<8x8xf32>
    %13 = vector.broadcast %3 : vector<8x1xi32> to vector<8x8xi32>
    %14 = vector.broadcast %4 : vector<1x8xi32> to vector<8x8xi32>
    %15 = arith.cmpi eq, %13, %14 : vector<8x8xi32>
    %cst_11 = arith.constant 0.000000e+00 : f32
    %cst_12 = arith.constant 1.000000e+30 : f32
    %16 = arith.subf %cst_11, %cst_12 : f32
    %17 = vector.broadcast %16 : f32 to vector<8x8xf32>
    %18 = arith.select %15, %12, %17 : vector<8x8xi1>, vector<8x8xf32>
    %cst_13 = arith.constant dense<0xFF800000> : vector<8xf32>
    %19 = vector.multi_reduction <maximumf>, %18, %cst_13 [1] : vector<8x8xf32> to vector<8xf32>
    %20 = vector.shape_cast %19 : vector<8xf32> to vector<8x1xf32>
    %21 = arith.addf %8, %20 : vector<8x1xf32>
    %cst_14 = arith.constant 1.000000e+30 : f32
    %22 = vector.broadcast %cst_14 : f32 to vector<8x8xf32>
    %23 = arith.select %15, %22, %12 : vector<8x8xi1>, vector<8x8xf32>
    %cst_15 = arith.constant dense<0x7F800000> : vector<8xf32>
    %24 = vector.multi_reduction <minimumf>, %23, %cst_15 [1] : vector<8x8xf32> to vector<8xf32>
    %25 = vector.shape_cast %24 : vector<8xf32> to vector<8x1xf32>
    %26 = arith.addf %8, %25 : vector<8x1xf32>
    %cst_16 = arith.constant 9.99999996E-13 : f32
    %27 = vector.broadcast %cst_16 : f32 to vector<8x1xf32>
    %28 = arith.maximumf %21, %27 : vector<8x1xf32>
    %29 = math.sqrt %28 : vector<8x1xf32>
    %cst_17 = arith.constant 9.99999996E-13 : f32
    %30 = vector.broadcast %cst_17 : f32 to vector<8x1xf32>
    %31 = arith.maximumf %26, %30 : vector<8x1xf32>
    %32 = math.sqrt %31 : vector<8x1xf32>
    %33 = arith.subf %29, %32 : vector<8x1xf32>
    %cst_18 = arith.constant 3.000000e-01 : f32
    %34 = vector.broadcast %cst_18 : f32 to vector<8x1xf32>
    %35 = arith.addf %33, %34 : vector<8x1xf32>
    %cst_19 = arith.constant 0.000000e+00 : f32
    %36 = vector.broadcast %cst_19 : f32 to vector<8x1xf32>
    %37 = arith.maximumf %35, %36 : vector<8x1xf32>
    %c0_20 = arith.constant 0 : index
    %c0_21 = arith.constant 0 : index
    %38 = vector.load %arg6[%c0_20, %c0_21] : memref<8x1xf32, #tpu.memory_space<vmem>>, vector<8x1xf32>
    tpu.vector_store %arg6[%c0_20, %c0_21], %37 {strides = array<i32>} : memref<8x1xf32, #tpu.memory_space<vmem>>, vector<8x1xf32>,
    return
  }
  func.func @transform_0(%arg0: i32) -> (i32, i32) {
    %c0_i32 = arith.constant 0 : i32
    %c0_i32_0 = arith.constant 0 : i32
    return %arg0, %c0_i32 : i32, i32
  }
  func.func @transform_1(%arg0: i32) -> (i32, i32) {
    %c0_i32 = arith.constant 0 : i32
    %c0_i32_0 = arith.constant 0 : i32
    %c0_i32_1 = arith.constant 0 : i32
    return %c0_i32, %c0_i32_0 : i32, i32
  }
  func.func @transform_2(%arg0: i32) -> (i32, i32) {
    %c0_i32 = arith.constant 0 : i32
    %c0_i32_0 = arith.constant 0 : i32
    %c0_i32_1 = arith.constant 0 : i32
    return %c0_i32, %c0_i32_0 : i32, i32
  }
  func.func @transform_3(%arg0: i32) -> (i32, i32) {
    %c0_i32 = arith.constant 0 : i32
    %c0_i32_0 = arith.constant 0 : i32
    return %arg0, %c0_i32 : i32, i32
  }
  func.func @transform_4(%arg0: i32) -> (i32, i32) {
    %c0_i32 = arith.constant 0 : i32
    %c0_i32_0 = arith.constant 0 : i32
    %c0_i32_1 = arith.constant 0 : i32
    return %c0_i32, %c0_i32_0 : i32, i32
  }
  func.func @transform_5(%arg0: i32) -> (i32, i32) {
    %c0_i32 = arith.constant 0 : i32
    %c0_i32_0 = arith.constant 0 : i32
    return %arg0, %c0_i32 : i32, i32
  }
}

</mosaic_0001>

<bundles_post_ra>
// kernel: tpu_custom_call.1
= control target key start
LH: loop header
LB: loop body
LE: loop exit
PB: predicated region body
PF: predicated region fallthrough
CT: control target
= control target key end

     0   :  { %10 = vsyncpa [#allocation3], 0  ;;  %s205_s18 = smov [#allocation2]   ;;  %s266_s0 = inlined_call_operand.vmem [shape: f32[8,128], index: 0, kind: input, shape index: {}]   ;;  %s267_s1 = inlined_call_operand.hbm [shape: f32[8,128], index: 1, kind: input, shape index: {}]   ;;  %s268_s2 = inlined_call_operand.vmem [shape: f32[1,8], index: 2, kind: input, shape index: {}]   ;;  %s269_s3 = inlined_call_operand.vmem [shape: s32[8,1], index: 3, kind: input, shape index: {}]   ;;  %s270_s4 = inlined_call_operand.vmem [shape: s32[1,8], index: 4, kind: input, shape index: {}]   ;;  %s271_s5 = inlined_call_operand.vmem [shape: f32[8,1], index: 5, kind: output, shape index: {}]  }
   0x1   :  { %s19_s19 = sshll.u32 %s205_s18, 4  ;;  %s181_s22 = scalar_lea.hbm %s267_s1, 128  ;;  %s20_s19 = int_to_ptr.vmem [resolvable:$true] %s19_s19 }
   0x2   :  { %p182_p0 = scmp.ne.s32.totalorder %s267_s1, %s181_s22  ;;  %p185_p1 = scmp.lt.u32.totalorder %s181_s22, %s267_s1 }
   0x4   :  { %p187_p2 = pnand %p185_p1, %p182_p0 }
   0x6   :  { %190 = shalt.err (!%p187_p2)
}
   0x7   :  { %s191_s27 = scalar_lea.vmem %s20_s19, 128  ;;  %p196_p4 = scmp.lt.s32.totalorder %s20_s19, %s20_s19 }
   0x8   :  { %p192_p3 = scmp.ne.s32.totalorder %s20_s19, %s191_s27  ;;  %p197_p5 = scmp.lt.s32.totalorder %s191_s27, %s191_s27 }
   0xa   :  { %p198_p6 = por %p197_p5, %p196_p4 }
   0xc   :  { %p199_p7 = pnand %p198_p6, %p192_p3 }
   0xe   :  { %202 = shalt.err (!%p199_p7)
}
   0xf   :  { %22 = dma.hbm_to_vmem [thread:$0]  %s267_s1, 128, %s20_s19, [#allocation3]  }
  0x10   :  { %203 = dma.done.wait [#allocation3], 128  }
  0x11   :  { %204 = vsyncadd [#allocation3], 4294967168  ;;  %v206_v0 = vmov 0.0   ;;  %vm207_vm0 = vmmov 0   ;;  %v208_v1 = vmov 0   ;;  %v33_v2 = vld [vmem:[#allocation2] sm:$0xff] }
  0x12   :  { %167 = vmatprep.subr.mxu0 %v206_v0  ;;  %169 = vmatprep.mubr.msk.f32.mxu0 %vm207_vm0, %v206_v0  ;;  %v35_v3 = vld [vmem:[%s269_s3] sm:$0xff]  ;;  %vm127_vm2 = vcmask 64512   ;;  %vm156_vm7 = vcmask 7168  }
  0x13   :  { %176 = vset.pattern.permute.xlu0 %v208_v1  ;;  %168 = vmatpush3.xpose.msra.mxu0 %v33_v2  ;;  %v32_v4 = vld [vmem:[%s266_s0] sm:$0xff] }
  0x14   :  { %119 = vperm.xlu0 %176, %v35_v3   ;;  %v107_v5 = vmul.f32 %v32_v4, %v32_v4  ;;  %v164_v6 = vld [vmem:[%s270_s4] ss:$0 sm:$0xff] }
  0x15   :  { %v163_v8 = vld [vmem:[%s268_s2] ss:$0 sm:$0xff] }
  0x16   :  { %170 = vmatmul.mubr.f32.vlgmr.msra.gmra.mrb[0].mxu0 %v32_v4 }
  0x33   :  { %108 = vadd.xlane.f32.xlu0 %v107_v5 }
  0x93   :  { %v120_v7 = vpop.permute.xlu0 %119 }
  0x94   :  { %vm125_vm1 = vcmp.eq.s32.totalorder %v120_v7, %v164_v6 }
  0xc0   :  { %v109_v17 = vpop.xlane.xlu0 %108 }
  0xe9   :  { %v103_v9 = vpop.f32.mrb[0].mxu0 }
  0xea   :  { %v110_v10 = vmul.f32 2.0, %v103_v9  ;;  %v171_v11 = vpop.f32.mrb[1].mxu0 }
  0xec   :  { %v117_v12 = vsub.f32 %v163_v8, %v110_v10 }
  0xee   :  { %v126_v13 = vsel %vm125_vm1, %v117_v12, -1e+30  ;;  %v132_v15 = vsel %vm125_vm1, 1e+30, %v117_v12 }
  0xef   :  { %v128_v14 = vsel %vm127_vm2, %v126_v13, -inf  ;;  %v133_v16 = vsel %vm127_vm2, %v132_v15, inf }
  0xf0   :  { %129 = vmax.xlane.f32.xlu1 %v128_v14 }
  0xf4   :  { %134 = vmin.xlane.f32.xlu1 %v133_v16 }
 0x17d   :  { %v130_v18 = vpop.xlane.xlu1 %129 }
 0x17e   :  { %v131_v19 = vadd.f32 %v130_v18, %v109_v17 }
 0x180   :  { %v137_v20 = vmax.f32 %v131_v19, 1e-12 }
 0x181   :  { %v135_v21 = vpop.xlane.xlu1 %134 }
 0x182   :  { %177 = vrsqrt.f32 %v137_v20  ;;  %v136_v22 = vadd.f32 %v135_v21, %v109_v17  ;;  %vm140_vm3 = vcmp.eq.f32.partialorder %v137_v20, inf  ;;  %v143_v29 = vand.u32 2147483648, %v137_v20 }
 0x183   :  { %vm142_vm5 = vcmp.eq.f32.partialorder %v137_v20, 0.0 }
 0x184   :  { %v145_v23 = vmax.f32 %v136_v22, 1e-12 }
 0x186   :  { %179 = vrsqrt.f32 %v145_v23  ;;  %vm148_vm4 = vcmp.eq.f32.partialorder %v145_v23, inf  ;;  %v151_v30 = vand.u32 2147483648, %v145_v23  ;;  %vm150_vm6 = vcmp.eq.f32.partialorder %v145_v23, 0.0 }
 0x18c   :  { %v178_v24 = vpop.eup %177 }
 0x18d   :  { %v139_v25 = vmul.f32 %v178_v24, %v137_v20 }
 0x18f   :  { %v141_v27 = vsel %vm140_vm3, %v137_v20, %v139_v25 }
 0x190   :  { %v180_v26 = vpop.eup %179  ;;  %v144_v32 = vsel %vm142_vm5, %v143_v29, %v141_v27 }
 0x191   :  { %v147_v28 = vmul.f32 %v180_v26, %v145_v23 }
 0x193   :  { %v149_v31 = vsel %vm148_vm4, %v145_v23, %v147_v28 }
 0x194   :  { %v152_v33 = vsel %vm150_vm6, %v151_v30, %v149_v31 }
 0x195   :  { %v153_v34 = vsub.f32 %v144_v32, %v152_v33 }
 0x197   :  { %v154_v35 = vadd.f32 0.3, %v153_v34 }
 0x199   :  { %v155_v36 = vmax.f32 %v154_v35, 0.0 }
 0x19b   :  { %157 = vst.msk [vmem:[%s271_s5] sm:$0xff] %vm156_vm7, %v155_v36 }
 0x19c   :  { %162 = vsyncpa [#allocation3], 1 }

</bundles_post_ra>
